<compile_context>
chip_gen: v5e
topology: v5e:2x2
jax: 0.10.0
libtpu: 0.0.40
codegen_flags: <defaults>
</compile_context>

<pallas_src>
import functools

import jax
import jax.numpy as jnp
from jax.experimental import pallas as pl
from jax.experimental.pallas import tpu as pltpu


def _round_up(x, m):
    return ((x + m - 1) // m) * m


def _cdiv(a, b):
    return -(-a // b)


def maxout_kernel(x_ref, w_ref, b_ref, o_ref, *, pool_size):
    """x_ref: (tb, inp_dim) f32, w_ref: (pool, inp_dim, out_pad) bf16,
    b_ref: (pool, 1, out_pad) f32, o_ref: (tb, out_pad) f32."""
    # Cast activations to bf16 on the VPU inside the kernel (no separate
    # wrapper-side HBM cast pass).
    xb = x_ref[...].astype(jnp.bfloat16)
    # Incremental pool max: one MXU matmul (f32 accumulation) per pool group,
    # each group 128-lane aligned, maximum on the VPU. pool_size is small and
    # static -> the Python loop is unrolled at trace time.
    acc = jnp.dot(xb, w_ref[0], preferred_element_type=jnp.float32) + b_ref[0]
    for p in range(1, pool_size):
        g = jnp.dot(xb, w_ref[p], preferred_element_type=jnp.float32) + b_ref[p]
        acc = jnp.maximum(acc, g)
    o_ref[...] = acc.astype(o_ref.dtype)


def pack_maxout_params(weight, bias, out_dim, pool_size):
    """Repack PyTorch nn.Linear params ONCE (hoisted out of the forward path).

    weight: (out_dim*pool_size, inp_dim), row index = o*pool_size + p
            (because out.view(-1, out_dim, pool_size) puts pool last)
    bias:   (out_dim*pool_size,)
    Returns:
      w_packed: (pool_size, inp_dim, out_pad) bf16   (out_pad = round_up(out_dim,128))
      b_packed: (pool_size, 1, out_pad) f32
    Padded output lanes carry zero weight/bias; they only ever compete with
    other padded lanes in the max and are sliced off by [:, :out_dim].
    """
    inp_dim = weight.shape[1]
    out_pad = _round_up(out_dim, 128)  # lane-dense per-pool group

    w = weight.reshape(out_dim, pool_size, inp_dim).transpose(1, 2, 0)  # (P,I,O)
    w = jnp.pad(w, ((0, 0), (0, 0), (0, out_pad - out_dim)))            # (P,I,Opad)

    b = bias.reshape(out_dim, pool_size).T                               # (P,O)
    b = jnp.pad(b, ((0, 0), (0, out_pad - out_dim)))                     # (P,Opad)
    b = b.reshape(pool_size, 1, out_pad)

    return w.astype(jnp.bfloat16), b.astype(jnp.float32)


@functools.partial(jax.jit, static_argnums=(3, 4))
def maxout_forward(x, w_packed, b_packed, out_dim, pool_size):
    """x: (B, inp_dim) f32; returns (B, out_dim) f32."""
    B, inp_dim = x.shape
    out_pad = w_packed.shape[-1]

    # ---- generation-aware VMEM budget -------------------------------------
    try:
        vmem_phys = int(pltpu.get_tpu_info().vmem_capacity_bytes)
    except Exception:
        vmem_phys = 64 * 1024 * 1024  # v7x (smallest VMEM) as conservative default
    vmem_limit = min(int(vmem_phys * 0.85), 100 * 1024 * 1024)

    # Resident (constant index_map) weight/bias still get double-buffered by
    # the default pipeline -> count them twice when budgeting the batch tile.
    static_bytes = 2 * (w_packed.size * 2 + b_packed.size * 4)
    # Per-batch-row VMEM: double-buffered f32 x tile + in-kernel bf16 copy,
    # double-buffered f32 out tile + running-max / partial-dot f32 temps.
    per_row = inp_dim * (2 * 4 + 2) + out_pad * (2 * 4 + 2 * 4)
    avail = vmem_limit - static_bytes - (4 << 20)  # headroom for compiler scratch
    if avail <= per_row * 16:
        # TODO(synk): stream the weight with an N (and K) grid axis instead of
        # keeping it resident when a single layer does not fit in VMEM.
        raise ValueError("MaxOut weight too large for resident-weight kernel")
    tb_cap = min(1024, max(16, (avail // per_row) // 16 * 16))

    # ---- batch tile: >=2 grid blocks (v7x megacore), 16-row granularity
    # (bf16 sublane packing), bounded padding waste ---------------------------
    n_blocks = max(2, _cdiv(B, tb_cap))
    tb = max(16, min(tb_cap, _round_up(_cdiv(B, n_blocks), 16)))
    b_pad = _round_up(B, tb)
    x_p = x if b_pad == B else jnp.pad(x, ((0, b_pad - B), (0, 0)))

    kernel = functools.partial(maxout_kernel, pool_size=pool_size)

    cost = pl.CostEstimate(
        flops=2 * b_pad * inp_dim * pool_size * out_pad,
        transcendentals=0,
        bytes_accessed=(b_pad * inp_dim * 4 + w_packed.size * 2
                        + b_packed.size * 4 + b_pad * out_pad * 4),
    )

    out_padded = pl.pallas_call(
        kernel,
        out_shape=jax.ShapeDtypeStruct((b_pad, out_pad), jnp.float32),
        grid=(b_pad // tb,),
        in_specs=[
            # Activations stream, one B-tile per grid step (f32; cast in-kernel).
            pl.BlockSpec((tb, inp_dim), lambda i: (i, 0)),
            # Weights / bias: same block every step -> resident, DMA'd once.
            pl.BlockSpec((pool_size, inp_dim, out_pad), lambda i: (0, 0, 0)),
            pl.BlockSpec((pool_size, 1, out_pad), lambda i: (0, 0, 0)),
        ],
        out_specs=pl.BlockSpec((tb, out_pad), lambda i: (i, 0)),
        compiler_params=pltpu.CompilerParams(
            dimension_semantics=("parallel",),   # megacore sharding on v7x
            vmem_limit_bytes=vmem_limit,
        ),
        cost_estimate=cost,
    )(x_p, w_packed, b_packed)

    return out_padded[:B, :out_dim]


if __name__ == "__main__":
    BATCH_SIZE = 32
    INPUT_DIM = 5
    OUT_DIM = 8
    POOL_SIZE = 3

    key = jax.random.PRNGKey(0)
    kx, kw, kb = jax.random.split(key, 3)

    x = jax.random.uniform(kx, (BATCH_SIZE, INPUT_DIM), dtype=jnp.float32)

    # Deterministic init mimicking nn.Linear default: U(-1/sqrt(in), 1/sqrt(in))
    bound = 1.0 / (INPUT_DIM ** 0.5)
    weight = jax.random.uniform(
        kw, (OUT_DIM * POOL_SIZE, INPUT_DIM), minval=-bound, maxval=bound,
        dtype=jnp.float32)
    bias = jax.random.uniform(
        kb, (OUT_DIM * POOL_SIZE,), minval=-bound, maxval=bound,
        dtype=jnp.float32)

    # Pack once at parameter-load time (not in the per-call forward path).
    w_packed, b_packed = pack_maxout_params(weight, bias, OUT_DIM, POOL_SIZE)

    out = maxout_forward(x, w_packed, b_packed, OUT_DIM, POOL_SIZE)
    jax.block_until_ready(out)

    # Reference check in plain JAX (matches the PyTorch forward, f32).
    ref = (x @ weight.T + bias).reshape(BATCH_SIZE, OUT_DIM, POOL_SIZE).max(-1)
    assert out.shape == (BATCH_SIZE, OUT_DIM)
    # bf16 matmul inputs (f32 accumulation) -> looser tolerance than pure f32.
    assert jnp.allclose(out, ref, atol=5e-2, rtol=5e-2), "mismatch vs reference"

    print("KERNEL_OK")
</pallas_src>

<mosaic_0001>
module attributes {stable_mosaic.version = 11 : i64} {
  func.func @maxout_kernel(%arg0: i32, %arg1: memref<16x5xf32, #tpu.memory_space<vmem>>, %arg2: memref<3x5x128xbf16, #tpu.memory_space<vmem>>, %arg3: memref<3x1x128xf32, #tpu.memory_space<vmem>>, %arg4: memref<16x128xf32, #tpu.memory_space<vmem>>) attributes {dimension_semantics = [#tpu.dimension_semantics<parallel>], iteration_bounds = array<i64: 2>, scalar_prefetch = 0 : i64, scratch_operands = 0 : i64, tpu.core_type = #tpu.core_type<tc>, window_params = [{transform_indices = @transform_0, window_bounds = array<i64: 16, 5>}, {pipeline_mode = #tpu.pipeline_mode<synchronous>, transform_indices = @transform_1, window_bounds = array<i64: 3, 5, 128>}, {pipeline_mode = #tpu.pipeline_mode<synchronous>, transform_indices = @transform_2, window_bounds = array<i64: 3, 1, 128>}, {transform_indices = @transform_3, window_bounds = array<i64: 16, 128>}]} {
    %c0 = arith.constant 0 : index
    %c0_0 = arith.constant 0 : index
    %0 = vector.load %arg1[%c0, %c0_0] : memref<16x5xf32, #tpu.memory_space<vmem>>, vector<16x5xf32>
    %1 = arith.truncf %0 : vector<16x5xf32> to vector<16x5xbf16>
    %c0_1 = arith.constant 0 : index
    %c0_2 = arith.constant 0 : index
    %c0_3 = arith.constant 0 : index
    %2 = vector.load %arg2[%c0_1, %c0_2, %c0_3] : memref<3x5x128xbf16, #tpu.memory_space<vmem>>, vector<1x5x128xbf16>
    %3 = vector.shape_cast %2 : vector<1x5x128xbf16> to vector<5x128xbf16>
    %cst = arith.constant dense<0.000000e+00> : vector<16x128xf32>
    %4 = tpu.matmul %1, %3, %cst {dimension_numbers = #tpu.dot_dimension_numbers<[1], [0], [0], [1], [0, 0, 1, 1], [], []>} : vector<16x5xbf16>, vector<5x128xbf16>, vector<16x128xf32> -> vector<16x128xf32>
    %c0_4 = arith.constant 0 : index
    %c0_5 = arith.constant 0 : index
    %c0_6 = arith.constant 0 : index
    %5 = vector.load %arg3[%c0_4, %c0_5, %c0_6] : memref<3x1x128xf32, #tpu.memory_space<vmem>>, vector<1x1x128xf32>
    %6 = vector.shape_cast %5 : vector<1x1x128xf32> to vector<1x128xf32>
    %7 = vector.broadcast %6 : vector<1x128xf32> to vector<16x128xf32>
    %8 = arith.addf %4, %7 : vector<16x128xf32>
    %c1 = arith.constant 1 : index
    %c0_7 = arith.constant 0 : index
    %c0_8 = arith.constant 0 : index
    %9 = vector.load %arg2[%c1, %c0_7, %c0_8] : memref<3x5x128xbf16, #tpu.memory_space<vmem>>, vector<1x5x128xbf16>
    %10 = vector.shape_cast %9 : vector<1x5x128xbf16> to vector<5x128xbf16>
    %cst_9 = arith.constant dense<0.000000e+00> : vector<16x128xf32>
    %11 = tpu.matmul %1, %10, %cst_9 {dimension_numbers = #tpu.dot_dimension_numbers<[1], [0], [0], [1], [0, 0, 1, 1], [], []>} : vector<16x5xbf16>, vector<5x128xbf16>, vector<16x128xf32> -> vector<16x128xf32>
    %c1_10 = arith.constant 1 : index
    %c0_11 = arith.constant 0 : index
    %c0_12 = arith.constant 0 : index
    %12 = vector.load %arg3[%c1_10, %c0_11, %c0_12] : memref<3x1x128xf32, #tpu.memory_space<vmem>>, vector<1x1x128xf32>
    %13 = vector.shape_cast %12 : vector<1x1x128xf32> to vector<1x128xf32>
    %14 = vector.broadcast %13 : vector<1x128xf32> to vector<16x128xf32>
    %15 = arith.addf %11, %14 : vector<16x128xf32>
    %16 = arith.maximumf %8, %15 : vector<16x128xf32>
    %c2 = arith.constant 2 : index
    %c0_13 = arith.constant 0 : index
    %c0_14 = arith.constant 0 : index
    %17 = vector.load %arg2[%c2, %c0_13, %c0_14] : memref<3x5x128xbf16, #tpu.memory_space<vmem>>, vector<1x5x128xbf16>
    %18 = vector.shape_cast %17 : vector<1x5x128xbf16> to vector<5x128xbf16>
    %cst_15 = arith.constant dense<0.000000e+00> : vector<16x128xf32>
    %19 = tpu.matmul %1, %18, %cst_15 {dimension_numbers = #tpu.dot_dimension_numbers<[1], [0], [0], [1], [0, 0, 1, 1], [], []>} : vector<16x5xbf16>, vector<5x128xbf16>, vector<16x128xf32> -> vector<16x128xf32>
    %c2_16 = arith.constant 2 : index
    %c0_17 = arith.constant 0 : index
    %c0_18 = arith.constant 0 : index
    %20 = vector.load %arg3[%c2_16, %c0_17, %c0_18] : memref<3x1x128xf32, #tpu.memory_space<vmem>>, vector<1x1x128xf32>
    %21 = vector.shape_cast %20 : vector<1x1x128xf32> to vector<1x128xf32>
    %22 = vector.broadcast %21 : vector<1x128xf32> to vector<16x128xf32>
    %23 = arith.addf %19, %22 : vector<16x128xf32>
    %24 = arith.maximumf %16, %23 : vector<16x128xf32>
    %c0_19 = arith.constant 0 : index
    %c0_20 = arith.constant 0 : index
    %25 = vector.load %arg4[%c0_19, %c0_20] : memref<16x128xf32, #tpu.memory_space<vmem>>, vector<16x128xf32>
    tpu.vector_store %arg4[%c0_19, %c0_20], %24 {strides = array<i32>} : memref<16x128xf32, #tpu.memory_space<vmem>>, vector<16x128xf32>,
    return
  }
  func.func @transform_0(%arg0: i32) -> (i32, i32) {
    %c0_i32 = arith.constant 0 : i32
    %c0_i32_0 = arith.constant 0 : i32
    return %arg0, %c0_i32 : i32, i32
  }
  func.func @transform_1(%arg0: i32) -> (i32, i32, i32) {
    %c0_i32 = arith.constant 0 : i32
    %c0_i32_0 = arith.constant 0 : i32
    %c0_i32_1 = arith.constant 0 : i32
    %c0_i32_2 = arith.constant 0 : i32
    return %c0_i32, %c0_i32_0, %c0_i32_1 : i32, i32, i32
  }
  func.func @transform_2(%arg0: i32) -> (i32, i32, i32) {
    %c0_i32 = arith.constant 0 : i32
    %c0_i32_0 = arith.constant 0 : i32
    %c0_i32_1 = arith.constant 0 : i32
    %c0_i32_2 = arith.constant 0 : i32
    return %c0_i32, %c0_i32_0, %c0_i32_1 : i32, i32, i32
  }
  func.func @transform_3(%arg0: i32) -> (i32, i32) {
    %c0_i32 = arith.constant 0 : i32
    %c0_i32_0 = arith.constant 0 : i32
    return %arg0, %c0_i32 : i32, i32
  }
}

</mosaic_0001>

<bundles_post_ra>
// kernel: maxout_forward.1
= control target key start
LH: loop header
LB: loop body
LE: loop exit
PB: predicated region body
PF: predicated region fallthrough
CT: control target
= control target key end

     0   :  { %s377_s12 = smov 0   ;;  %s412_s0 = inlined_call_operand.vmem [shape: f32[32,5], index: 0, kind: input, shape index: {}]   ;;  %s413_s1 = inlined_call_operand.vmem [shape: bf16[3,5,128], index: 1, kind: input, shape index: {}]   ;;  %s414_s2 = inlined_call_operand.vmem [shape: f32[3,1,128], index: 2, kind: input, shape index: {}]   ;;  %s415_s3 = inlined_call_operand.vmem [shape: f32[32,128], index: 3, kind: output, shape index: {}]  }
   0x1 LB: > { %s318_s13 = sadd.s32 4294967295, %s354_s12   ;;  %p322_p0 = scmp.ge.s32.totalorder %s354_s12, 1  ;;  %s354_s12 = sphi %s377_s12, %s13_s12  }
   0x2   : > { %p138_p1 = scmp.lt.s32.totalorder %s354_s12, 3 }
   0x4   : > { %p139_p2 = pnand %p322_p0, %p138_p1 }
   0x5   : > { %s323_s16 = sshll.u32 (!%p139_p2), %s318_s13, 1 }
   0x6   : > { %142 = sbr.rel (%p139_p2) target bundleno = 165 (0xa5), region = 32  ;;  %p163_p3 = scmp.lt.s32.totalorder (!%p139_p2), %s323_s16, 3 }
   0xb   : > { %v178_v0 = vld [vmem:[%s413_s1] sm:$0x7]  ;;  %vm187_vm0 = vcmask 1041408   ;;  %vm188_vm1 = vcmask 1042432   ;;  %v356_v1 = vmov 65535   ;;  %s417_s16 = smov (!%p163_p3, %s323_s16), 3 }
   0xc   : > { %v189_v2 = vsel %vm187_vm0, 4294967295, %v356_v1  ;;  %v328_v3 = vld [vmem:[%s413_s1 + $0x4] sm:$0x7]  ;;  %v331_v4 = vld [vmem:[%s413_s1 + $0x8] sm:$0x7]  ;;  %s324_s21 = sshll.u32 %s417_s16, 3 }
   0xd   : > { %v190_v5 = vsel %vm188_vm1, %v189_v2, 0  ;;  %s166_s24 = scalar_lea.vmem %s412_s0, %s324_s21  ;;  %vm183_vm2 = vcmask 39936   ;;  %v345_v12 = vld [vmem:[%s414_s2] ss:$0 sm:$0xff]  ;;  %v346_v13 = vld [vmem:[%s414_s2 + $0x1] ss:$0 sm:$0xff]  ;;  %s172_s6 = scalar_lea.vmem %s415_s3, %s324_s21 }
   0xe   : > { %v192_v6 = vand.u32 %v190_v5, %v178_v0  ;;  %v216_v7 = vand.u32 %v328_v3, %v190_v5  ;;  %v242_v8 = vand.u32 %v331_v4, %v190_v5  ;;  %v175_v9 = vld [vmem:[%s166_s24] sm:$0xff]  ;;  %v176_v10 = vld [vmem:[%s166_s24 + $0x8] sm:$0xff] }
   0xf   : > { %v177_v11 = vpack.c.bf16 %v176_v10, %v175_v9  ;;  %v347_v18 = vld [vmem:[%s414_s2 + $0x2] ss:$0 sm:$0xff] }
  0x10   : > { %201 = vmatpush.bf16.msra.mxu0 %v192_v6  ;;  %225 = vmatpush.bf16.msra.mxu1 %v216_v7 }
  0x11   : > { %251 = vmatpush.bf16.msra.mxu2 %v242_v8 }
  0x13   : > { %327 = vmatmul.msk.bf16.vlgmr.msra.gmra.mxu0 %vm183_vm2, %v177_v11  ;;  %330 = vmatmul.msk.bf16.vlgmr.msra.gmra.mxu1 %vm183_vm2, %v177_v11 }
  0x14   : > { %333 = vmatmul.msk.bf16.vlgmr.msra.gmra.mxu2 %vm183_vm2, %v177_v11 }
  0x90   : > { %v203_v14 = vpop.f32.mrf.mxu0  ;;  %v227_v15 = vpop.f32.mrf.mxu1 }
  0x91   : > { %v204_v16 = vadd.f32 %v345_v12, %v203_v14  ;;  %v228_v17 = vadd.f32 %v346_v13, %v227_v15 }
  0x93   : > { %v232_v19 = vmax.f32 %v204_v16, %v228_v17 }
  0x97   : > { %v253_v20 = vpop.f32.mrf.mxu2 }
  0x98   : > { %v254_v21 = vadd.f32 %v347_v18, %v253_v20  ;;  %v205_v22 = vpop.f32.mrf.mxu0  ;;  %v229_v23 = vpop.f32.mrf.mxu1 }
  0x99   : > { %v206_v25 = vadd.f32 %v345_v12, %v205_v22  ;;  %v230_v26 = vadd.f32 %v346_v13, %v229_v23 }
  0x9a   : > { %v258_v24 = vmax.f32 %v232_v19, %v254_v21 }
  0x9b   : > { %v233_v28 = vmax.f32 %v206_v25, %v230_v26 }
  0x9c   : > { %260 = vst [vmem:[%s172_s6] sm:$0xff] %v258_v24 }
  0x9f   : > { %v255_v27 = vpop.f32.mrf.mxu2 }
  0xa0   : > { %v256_v29 = vadd.f32 %v347_v18, %v255_v27 }
  0xa2   : > { %v259_v30 = vmax.f32 %v233_v28, %v256_v29 }
  0xa4   : > { %261 = vst [vmem:[%s172_s6 + $0x8] sm:$0xff] %v259_v30 }
  0xa5 PF: > { %s13_s12 = sadd.s32 1, %s354_s12  }
  0xa6   : > { %p10_p4 = scmp.ge.s32.totalorder %s13_s12, 4  }
  0xa8   :  { %12 = sbr.rel (!%p10_p4) target bundleno = 1 (0x1), region = 66 }

</bundles_post_ra>
